<compile_context>
chip_gen: v5e
topology: v5e:2x2
jax: 0.10.0
libtpu: 0.0.40
codegen_flags: <defaults>
</compile_context>

<pallas_src>
import functools

import jax
import jax.numpy as jnp
from jax import lax
from jax.experimental import pallas as pl
from jax.experimental.pallas import tpu as pltpu


def _readout_kernel(x_ref, w_ref, b_ref, o_ref, acc_ref, *,
                    fold, d_in, n_rows, need_mask):
    # x_ref:   (Bt, Rt, Dl)   streamed tile of (possibly lane-folded) X
    # w_ref:   (d_in, out_pad) W^T, VMEM-resident (constant index_map)
    # b_ref:   (1, out_pad)    bias, VMEM-resident
    # o_ref:   (Bt, out_pad)   output tile (same block across the seq axis)
    # acc_ref: (Bt, Dl) f32    running sum over the (folded) seq axis
    k = pl.program_id(1)

    @pl.when(k == 0)
    def _():
        acc_ref[...] = jnp.zeros_like(acc_ref)

    x = x_ref[...]
    if need_mask:
        # Ragged final seq tile: Pallas does NOT zero-fill partial blocks, so
        # mask stale rows before they enter the sum.  (jnp.where selects, so
        # NaN/Inf garbage in the stale region cannot propagate.)
        bt, rt, dl = x_ref.shape
        row = k * rt + lax.broadcasted_iota(jnp.int32, (bt, rt, dl), 1)
        x = jnp.where(row < n_rows, x, 0.0)

    # Partial reduction over this seq tile (sublane reduce; free filler while
    # the kernel is HBM-read bound).
    acc_ref[...] += jnp.sum(x, axis=1)

    @pl.when(k == pl.num_programs(1) - 1)
    def _():
        acc = acc_ref[...]
        if fold > 1:
            # Re-combine the lane-folded seq positions into (Bt, d_in).
            # Must happen BEFORE the ReLU: relu(a + b) != relu(a) + relu(b).
            s = acc[:, 0:d_in]
            for f in range(1, fold):
                s = s + acc[:, f * d_in:(f + 1) * d_in]
        else:
            s = acc
        s = jnp.maximum(s, 0.0)                                        # ReLU (VPU)
        o_ref[...] = (
            jnp.dot(s, w_ref[...], preferred_element_type=jnp.float32)  # MXU
            + b_ref[...]
        )


def readout_layer(x, weight, bias, *,
                  target_block_bytes=12 << 20,
                  vmem_limit_bytes=48 << 20):
    """x: (B, N, D) f32, weight: (out_dim, D), bias: (out_dim,) -> (B, out_dim)."""
    B, N, D = x.shape
    out_dim = weight.shape[0]
    itemsize = x.dtype.itemsize

    # ---- lane-dense output padding (avoid masked vst on tiny out_dim) ----
    out_pad = pl.cdiv(out_dim, 128) * 128

    # ---- lane fold for narrow D: view X as (B, N//fold, fold*D) ----
    fold = 1
    if 8 <= D < 128 and 128 % D == 0 and N % (128 // D) == 0:
        fold = 128 // D
    R = N // fold            # folded seq length
    Dl = D * fold            # lane width of the streamed tiles / accumulator
    xr = x.reshape(B, R, Dl) if fold > 1 else x   # row-major view, no copy

    def _round8(v):
        return ((v + 7) // 8) * 8

    # ---- batch tile: multiple of 8; >= 2 tiles when B > 8 (v7x megacore) ----
    Bt = min(128, _round8(B))
    if B > 8:
        Bt = min(Bt, _round8(pl.cdiv(B, 2)))
    # Degenerate guard (large D): even the minimum-height block must fit budget.
    while Bt > 8 and Bt * Dl * itemsize * 8 > target_block_bytes:
        Bt = max(8, ((Bt // 2) // 8) * 8)
    nb = pl.cdiv(B, Bt)

    # ---- seq tile: largest multiple of 8 keeping the X block <= budget ----
    row_bytes = Bt * Dl * itemsize
    cap = max(8, (target_block_bytes // row_bytes) // 8 * 8)
    if R <= cap:
        Rt, nk = R, 1
    else:
        Rt, nk = cap, pl.cdiv(R, cap)
    need_mask = (R % Rt) != 0

    # ---- tiny params, padded lane-dense (X itself is NOT padded) ----
    w_t = jnp.pad(weight.T.astype(jnp.float32),
                  ((0, 0), (0, out_pad - out_dim)))            # (D, out_pad)
    b2 = jnp.pad(bias.astype(jnp.float32),
                 (0, out_pad - out_dim)).reshape(1, out_pad)   # (1, out_pad)

    kernel = functools.partial(_readout_kernel, fold=fold, d_in=D,
                               n_rows=R, need_mask=need_mask)

    cost = pl.CostEstimate(
        flops=B * N * D + 2 * B * D * out_dim,     # reduction adds + matmul
        bytes_accessed=itemsize * (B * N * D + D * out_pad + out_pad
                                   + nb * Bt * out_pad),
        transcendentals=0,
    )

    out = pl.pallas_call(
        kernel,
        out_shape=jax.ShapeDtypeStruct((nb * Bt, out_pad), jnp.float32),
        grid_spec=pltpu.PrefetchScalarGridSpec(
            num_scalar_prefetch=0,
            grid=(nb, nk),
            in_specs=[
                pl.BlockSpec((Bt, Rt, Dl), lambda i, k: (i, k, 0)),   # streamed X
                pl.BlockSpec((D, out_pad), lambda i, k: (0, 0)),      # resident W^T
                pl.BlockSpec((1, out_pad), lambda i, k: (0, 0)),      # resident bias
            ],
            out_specs=pl.BlockSpec((Bt, out_pad), lambda i, k: (i, 0)),
            scratch_shapes=[pltpu.VMEM((Bt, Dl), jnp.float32)],
        ),
        compiler_params=pltpu.CompilerParams(
            dimension_semantics=("parallel", "arbitrary"),
            vmem_limit_bytes=vmem_limit_bytes,
        ),
        cost_estimate=cost,
    )(xr, w_t, b2)

    # Garbage batch rows / padded output lanes are sliced off here.
    return out[:B, :out_dim]


def readout_ref(x, weight, bias):
    s = jnp.maximum(jnp.sum(x, axis=1), 0.0)
    return s @ weight.T + bias


if __name__ == "__main__":
    key = jax.random.PRNGKey(0)

    def run_case(B, N, D, out_dim, **kw):
        k0 = jax.random.fold_in(key, B * 100000 + N * 1000 + D)
        kx, kwt, kb = jax.random.split(k0, 3)
        bound = 1.0 / (D ** 0.5)
        x = jax.random.normal(kx, (B, N, D), dtype=jnp.float32)
        weight = jax.random.uniform(kwt, (out_dim, D), minval=-bound,
                                    maxval=bound, dtype=jnp.float32)
        bias = jax.random.uniform(kb, (out_dim,), minval=-bound,
                                  maxval=bound, dtype=jnp.float32)
        out = jax.block_until_ready(readout_layer(x, weight, bias, **kw))
        ref = readout_ref(x, weight, bias)
        assert out.shape == (B, out_dim)
        assert jnp.allclose(out, ref, atol=1e-4, rtol=1e-4), \
            f"mismatch vs reference (B={B}, N={N}, D={D}, out={out_dim})"

    # Canonical small shape (exercises the lane-fold path: D=32 -> fold=4).
    run_case(2, 8, 32, 16)
    # Ragged seq tiles + multi-step accumulation + in-kernel mask (no fold).
    run_case(3, 13, 20, 5, target_block_bytes=6 * 1024)
    # Fold + two batch tiles (parallel axis) + ragged batch rows.
    run_case(20, 24, 16, 7)

    print("KERNEL_OK")
</pallas_src>

<mosaic_0001>
module attributes {stable_mosaic.version = 11 : i64} {
  func.func @_readout_kernel(%arg0: i32, %arg1: i32, %arg2: memref<8x2x128xf32, #tpu.memory_space<vmem>>, %arg3: memref<32x128xf32, #tpu.memory_space<vmem>>, %arg4: memref<1x128xf32, #tpu.memory_space<vmem>>, %arg5: memref<8x128xf32, #tpu.memory_space<vmem>>, %arg6: memref<8x128xf32, #tpu.memory_space<vmem>>) attributes {dimension_semantics = [#tpu.dimension_semantics<parallel>, #tpu.dimension_semantics<arbitrary>], iteration_bounds = array<i64: 1, 1>, scalar_prefetch = 0 : i64, scratch_operands = 1 : i64, tpu.core_type = #tpu.core_type<tc>, window_params = [{transform_indices = @transform_0, window_bounds = array<i64: 8, 2, 128>}, {pipeline_mode = #tpu.pipeline_mode<synchronous>, transform_indices = @transform_1, window_bounds = array<i64: 32, 128>}, {pipeline_mode = #tpu.pipeline_mode<synchronous>, transform_indices = @transform_2, window_bounds = array<i64: 1, 128>}, {transform_indices = @transform_3, window_bounds = array<i64: 8, 128>}]} {
    %c0_i32 = arith.constant 0 : i32
    %0 = arith.cmpi eq, %arg1, %c0_i32 : i32
    %1 = arith.extui %0 : i1 to i32
    %c0_i32_0 = arith.constant 0 : i32
    %2 = arith.cmpi ne, %1, %c0_i32_0 : i32
    scf.if %2 {
      %cst_9 = arith.constant 0.000000e+00 : f32
      %11 = vector.broadcast %cst_9 : f32 to vector<8x128xf32>
      %c0_10 = arith.constant 0 : index
      %c0_11 = arith.constant 0 : index
      %12 = vector.load %arg6[%c0_10, %c0_11] : memref<8x128xf32, #tpu.memory_space<vmem>>, vector<8x128xf32>
      tpu.vector_store %arg6[%c0_10, %c0_11], %11 {strides = array<i32>} : memref<8x128xf32, #tpu.memory_space<vmem>>, vector<8x128xf32>,
    } else {
    }
    %c0 = arith.constant 0 : index
    %c0_1 = arith.constant 0 : index
    %c0_2 = arith.constant 0 : index
    %3 = vector.load %arg2[%c0, %c0_1, %c0_2] : memref<8x2x128xf32, #tpu.memory_space<vmem>>, vector<8x2x128xf32>
    %c0_3 = arith.constant 0 : index
    %c0_4 = arith.constant 0 : index
    %4 = vector.load %arg6[%c0_3, %c0_4] : memref<8x128xf32, #tpu.memory_space<vmem>>, vector<8x128xf32>
    %cst = arith.constant dense<0.000000e+00> : vector<8x128xf32>
    %5 = vector.multi_reduction <add>, %3, %cst [1] : vector<8x2x128xf32> to vector<8x128xf32>
    %6 = arith.addf %4, %5 : vector<8x128xf32>
    %c0_5 = arith.constant 0 : index
    %c0_6 = arith.constant 0 : index
    %7 = vector.load %arg6[%c0_5, %c0_6] : memref<8x128xf32, #tpu.memory_space<vmem>>, vector<8x128xf32>
    tpu.vector_store %arg6[%c0_5, %c0_6], %6 {strides = array<i32>} : memref<8x128xf32, #tpu.memory_space<vmem>>, vector<8x128xf32>,
    %c0_i32_7 = arith.constant 0 : i32
    %8 = arith.cmpi eq, %arg1, %c0_i32_7 : i32
    %9 = arith.extui %8 : i1 to i32
    %c0_i32_8 = arith.constant 0 : i32
    %10 = arith.cmpi ne, %9, %c0_i32_8 : i32
    scf.if %10 {
      %c0_9 = arith.constant 0 : index
      %c0_10 = arith.constant 0 : index
      %11 = vector.load %arg6[%c0_9, %c0_10] : memref<8x128xf32, #tpu.memory_space<vmem>>, vector<8x128xf32>
      %12 = vector.extract_strided_slice %11 {offsets = [0, 0], sizes = [8, 32], strides = [1, 1]} : vector<8x128xf32> to vector<8x32xf32>
      %13 = vector.extract_strided_slice %11 {offsets = [0, 32], sizes = [8, 32], strides = [1, 1]} : vector<8x128xf32> to vector<8x32xf32>
      %14 = arith.addf %12, %13 : vector<8x32xf32>
      %15 = vector.extract_strided_slice %11 {offsets = [0, 64], sizes = [8, 32], strides = [1, 1]} : vector<8x128xf32> to vector<8x32xf32>
      %16 = arith.addf %14, %15 : vector<8x32xf32>
      %17 = vector.extract_strided_slice %11 {offsets = [0, 96], sizes = [8, 32], strides = [1, 1]} : vector<8x128xf32> to vector<8x32xf32>
      %18 = arith.addf %16, %17 : vector<8x32xf32>
      %cst_11 = arith.constant 0.000000e+00 : f32
      %19 = vector.broadcast %cst_11 : f32 to vector<8x32xf32>
      %20 = arith.maximumf %18, %19 : vector<8x32xf32>
      %c0_12 = arith.constant 0 : index
      %c0_13 = arith.constant 0 : index
      %21 = vector.load %arg3[%c0_12, %c0_13] : memref<32x128xf32, #tpu.memory_space<vmem>>, vector<32x128xf32>
      %cst_14 = arith.constant dense<0.000000e+00> : vector<8x128xf32>
      %22 = tpu.matmul %20, %21, %cst_14 {dimension_numbers = #tpu.dot_dimension_numbers<[1], [0], [0], [1], [0, 0, 1, 1], [], []>} : vector<8x32xf32>, vector<32x128xf32>, vector<8x128xf32> -> vector<8x128xf32>
      %c0_15 = arith.constant 0 : index
      %c0_16 = arith.constant 0 : index
      %23 = vector.load %arg4[%c0_15, %c0_16] : memref<1x128xf32, #tpu.memory_space<vmem>>, vector<1x128xf32>
      %24 = vector.broadcast %23 : vector<1x128xf32> to vector<8x128xf32>
      %25 = arith.addf %22, %24 : vector<8x128xf32>
      %c0_17 = arith.constant 0 : index
      %c0_18 = arith.constant 0 : index
      %26 = vector.load %arg5[%c0_17, %c0_18] : memref<8x128xf32, #tpu.memory_space<vmem>>, vector<8x128xf32>
      tpu.vector_store %arg5[%c0_17, %c0_18], %25 {strides = array<i32>} : memref<8x128xf32, #tpu.memory_space<vmem>>, vector<8x128xf32>,
    } else {
    }
    return
  }
  func.func @transform_0(%arg0: i32, %arg1: i32) -> (i32, i32, i32) {
    %c0_i32 = arith.constant 0 : i32
    %c0_i32_0 = arith.constant 0 : i32
    return %arg0, %arg1, %c0_i32 : i32, i32, i32
  }
  func.func @transform_1(%arg0: i32, %arg1: i32) -> (i32, i32) {
    %c0_i32 = arith.constant 0 : i32
    %c0_i32_0 = arith.constant 0 : i32
    %c0_i32_1 = arith.constant 0 : i32
    return %c0_i32, %c0_i32_0 : i32, i32
  }
  func.func @transform_2(%arg0: i32, %arg1: i32) -> (i32, i32) {
    %c0_i32 = arith.constant 0 : i32
    %c0_i32_0 = arith.constant 0 : i32
    %c0_i32_1 = arith.constant 0 : i32
    return %c0_i32, %c0_i32_0 : i32, i32
  }
  func.func @transform_3(%arg0: i32, %arg1: i32) -> (i32, i32) {
    %c0_i32 = arith.constant 0 : i32
    %c0_i32_0 = arith.constant 0 : i32
    return %arg0, %c0_i32 : i32, i32
  }
}

</mosaic_0001>

<bundles_post_ra>
// kernel: tpu_custom_call.1
= control target key start
LH: loop header
LB: loop body
LE: loop exit
PB: predicated region body
PF: predicated region fallthrough
CT: control target
= control target key end

     0   :  { %8 = vsyncpa [#allocation4], 0  ;;  %s356_s0 = inlined_call_operand.hbm [shape: f32[2,2,128], index: 0, kind: input, shape index: {}]   ;;  %s357_s1 = inlined_call_operand.hbm [shape: f32[32,128], index: 1, kind: input, shape index: {}]   ;;  %s358_s2 = inlined_call_operand.vmem [shape: f32[1,128], index: 2, kind: input, shape index: {}]   ;;  %s359_s3 = inlined_call_operand.hbm [shape: f32[8,128], index: 3, kind: output, shape index: {}]  }
   0x1   :  { %9 = vsyncpa [#allocation7], 0 }
   0x2   :  { %10 = vsyncpa [#allocation5], 0 }
   0x3   :  { %14 = vsyncadd [#allocation4], 192  ;;  %s15_s14 = sshll.u32 %s356_s0, 4  ;;  %s301_s15 = smov [#allocation3]   ;;  %s16_s14 = int_to_ptr.hbm [resolvable:$true] %s15_s14 }
   0x4   :  { %s17_s16 = sshll.u32 %s301_s15, 4  ;;  %s28_s19 = sshll.u32 %s357_s1, 4  ;;  %s18_s16 = int_to_ptr.vmem [resolvable:$true] %s17_s16  ;;  %s29_s19 = int_to_ptr.hbm [resolvable:$true] %s28_s19 }
   0x5   :  { %s302_s20 = smov 32   ;;  %s303_s21 = smov 2  }
   0x6   :  { %23 = dma.hbm_to_vmem [thread:$0]  %s16_s14, 64, %s18_s16, [#allocation4], %s302_s20, %s302_s20, %s303_s21  }
   0x7   :  { %s304_s22 = smov [#allocation6]   ;;  %s305_s24 = smov 128  }
   0x8   :  { %s30_s23 = sshll.u32 %s304_s22, 4  ;;  %s306_s25 = smov 8   ;;  %s31_s23 = int_to_ptr.vmem [resolvable:$true] %s30_s23 }
   0x9   :  { %36 = dma.hbm_to_vmem [thread:$0]  %s29_s19, 512, %s31_s23, [#allocation7], %s305_s24, %s305_s24, %s306_s25  }
   0xa   :  { %295 = dma.done.wait [#allocation4], 256  }
   0xb   :  { %296 = vsyncadd [#allocation4], 4294967040 }
   0xc   :  { %297 = dma.done.wait [#allocation7], 512  }
   0xd   :  { %298 = vsyncadd [#allocation7], 4294966784  ;;  %vm61_vm0 = vcmask 1041408   ;;  %v52_v0 = vld [vmem:[#allocation3] sm:$0x3]  ;;  %vm126_vm1 = vcmask 1041409  }
   0xe   :  { %v53_v1 = vld [vmem:[#allocation3 + $0x2] sm:$0x3]  ;;  %v54_v2 = vld [vmem:[#allocation3 + $0x4] sm:$0x3]  ;;  %v55_v3 = vld [vmem:[#allocation3 + $0x6] sm:$0x3] }
   0xf   :  { %v56_v4 = vld [vmem:[#allocation3 + $0x8] sm:$0x3]  ;;  %v57_v5 = vld [vmem:[#allocation3 + $0xa] sm:$0x3]  ;;  %v58_v6 = vld [vmem:[#allocation3 + $0xc] sm:$0x3] }
  0x10   :  { %v59_v7 = vld [vmem:[#allocation3 + $0xe] sm:$0x3]  ;;  %v62_v8 = vsel %vm61_vm0, %v52_v0, 0.0  ;;  %v69_v9 = vsel %vm61_vm0, %v53_v1, 0.0  ;;  %v76_v12 = vsel %vm61_vm0, %v54_v2, 0.0  ;;  %v83_v13 = vsel %vm61_vm0, %v55_v3, 0.0 }
  0x11   :  { %v63_v10 = vrot.slane %v62_v8, 4  ;;  %v70_v11 = vrot.slane %v69_v9, 4  ;;  %v77_v14 = vrot.slane %v76_v12, 4  ;;  %v84_v15 = vrot.slane %v83_v13, 4  ;;  %s307_s0 = smov 96   ;;  %s308_s1 = smov 64  }
  0x12   :  { %v90_v16 = vsel %vm61_vm0, %v56_v4, 0.0  ;;  %v97_v17 = vsel %vm61_vm0, %v57_v5, 0.0  ;;  %vm128_vm2 = vcmask 1042434   ;;  %v104_v24 = vsel %vm61_vm0, %v58_v6, 0.0  ;;  %s309_s28 = smov [#allocation8]   ;;  %s201_s5 = sshll.u32 %s359_s3, 4  ;;  %s202_s5 = int_to_ptr.hbm [resolvable:$true] %s201_s5 }
  0x13   :  { %v64_v18 = vadd.f32 %v63_v10, %v62_v8  ;;  %v71_v19 = vadd.f32 %v70_v11, %v69_v9  ;;  %v91_v20 = vrot.slane %v90_v16, 4  ;;  %v98_v21 = vrot.slane %v97_v17, 4  ;;  %v163_v8 = vld [vmem:[#allocation6 + $0x10] sm:$0xff]  ;;  %v162_v9 = vld [vmem:[#allocation6 + $0x8] sm:$0xff]  ;;  %v161_v10 = vld [vmem:[#allocation6] sm:$0xff]  ;;  %s199_s29 = sshll.u32 %s309_s28, 4  ;;  %s200_s29 = int_to_ptr.vmem [resolvable:$true] %s199_s29 }
  0x14   :  { %v78_v22 = vadd.f32 %v77_v14, %v76_v12  ;;  %v85_v23 = vadd.f32 %v84_v15, %v83_v13  ;;  %v111_v25 = vsel %vm61_vm0, %v59_v7, 0.0  ;;  %vm130_vm3 = vcmask 1043459   ;;  %v164_v7 = vld [vmem:[#allocation6 + $0x18] sm:$0xff] }
  0x15   :  { %v65_v26 = vrot.slane %v64_v18, 2  ;;  %v72_v27 = vrot.slane %v71_v19, 2  ;;  %v92_v28 = vadd.f32 %v91_v20, %v90_v16  ;;  %v99_v29 = vadd.f32 %v98_v21, %v97_v17  ;;  %185 = vmatpush.msra.mxu0 %v164_v7 }
  0x16   :  { %v79_v30 = vrot.slane %v78_v22, 2  ;;  %v86_v31 = vrot.slane %v85_v23, 2  ;;  %v105_v32 = vrot.slane %v104_v24, 4  ;;  %v112_v33 = vrot.slane %v111_v25, 4 }
  0x17   :  { %v66_v34 = vadd.f32 %v65_v26, %v64_v18  ;;  %v73_v35 = vadd.f32 %v72_v27, %v71_v19  ;;  %v93_v36 = vrot.slane %v92_v28, 2  ;;  %v100_v37 = vrot.slane %v99_v29, 2  ;;  %186 = vmatpush.msra.mxu0 %v163_v8  ;;  %v222_v18 = vld [vmem:[%s358_s2] ss:$0 sm:$0xff] }
  0x18   :  { %v80_v38 = vadd.f32 %v79_v30, %v78_v22  ;;  %v87_v39 = vadd.f32 %v86_v31, %v85_v23  ;;  %v106_v40 = vadd.f32 %v105_v32, %v104_v24  ;;  %v113_v41 = vadd.f32 %v112_v33, %v111_v25 }
  0x19   :  { %v67_v42 = vrot.slane %v66_v34, 1  ;;  %v74_v43 = vrot.slane %v73_v35, 1  ;;  %v94_v44 = vadd.f32 %v93_v36, %v92_v28  ;;  %v101_v45 = vadd.f32 %v100_v37, %v99_v29  ;;  %187 = vmatpush.msra.mxu0 %v162_v9 }
  0x1a   :  { %v81_v46 = vrot.slane %v80_v38, 1  ;;  %v88_v47 = vrot.slane %v87_v39, 1  ;;  %v107_v48 = vrot.slane %v106_v40, 2  ;;  %v114_v49 = vrot.slane %v113_v41, 2 }
  0x1b   :  { %v68_v50 = vadd.f32 %v67_v42, %v66_v34  ;;  %v75_v51 = vadd.f32 %v74_v43, %v73_v35  ;;  %v95_v52 = vrot.slane %v94_v44, 1  ;;  %v102_v53 = vrot.slane %v101_v45, 1  ;;  %188 = vmatpush.msra.mxu0 %v161_v10 }
  0x1c   :  { %v82_v54 = vadd.f32 %v81_v46, %v80_v38  ;;  %v89_v55 = vadd.f32 %v88_v47, %v87_v39  ;;  %v108_v56 = vadd.f32 %v107_v48, %v106_v40  ;;  %v115_v57 = vadd.f32 %v114_v49, %v113_v41 }
  0x1d   :  { %v96_v58 = vadd.f32 %v95_v52, %v94_v44  ;;  %v103_v59 = vadd.f32 %v102_v53, %v101_v45  ;;  %v127_v60 = vsel %vm126_vm1, %v75_v51, %v68_v50  ;;  %vm132_vm4 = vcmask 1044484  }
  0x1e   :  { %v109_v61 = vrot.slane %v108_v56, 1  ;;  %v116_v62 = vrot.slane %v115_v57, 1  ;;  %v129_v63 = vsel %vm128_vm2, %v82_v54, %v127_v60  ;;  %vm134_vm5 = vcmask 1045509  }
  0x1f   :  { %v131_v0 = vsel %vm130_vm3, %v89_v55, %v129_v63  ;;  %vm136_vm6 = vcmask 1046534   ;;  %vm138_vm7 = vcmask 1047559   ;;  %vm169_vm8 = vcmask 261120  }
  0x20   :  { %v110_v1 = vadd.f32 %v109_v61, %v108_v56  ;;  %v117_v2 = vadd.f32 %v116_v62, %v115_v57  ;;  %v133_v3 = vsel %vm132_vm4, %v96_v58, %v131_v0 }
  0x21   :  { %v135_v4 = vsel %vm134_vm5, %v103_v59, %v133_v3 }
  0x22   :  { %v137_v5 = vsel %vm136_vm6, %v110_v1, %v135_v4 }
  0x23   :  { %v139_v6 = vsel %vm138_vm7, %v117_v2, %v137_v5 }
  0x24   :  { %148 = vrot.lane.b32.xlu0 %v139_v6, %s307_s0  ;;  %156 = vrot.lane.b32.xlu1 %v139_v6, %s302_s20 }
  0x2c   :  { %152 = vrot.lane.b32.xlu0 %v139_v6, %s308_s1 }
  0x96   :  { %v149_v11 = vpop.permute.xlu0 %148  ;;  %v157_v14 = vpop.permute.xlu1 %156 }
  0x97   :  { %v151_v12 = vadd.f32 %v149_v11, %v139_v6 }
  0x9e   :  { %v153_v13 = vpop.permute.xlu0 %152 }
  0x9f   :  { %v155_v15 = vadd.f32 %v153_v13, %v151_v12 }
  0xa1   :  { %v159_v16 = vadd.f32 %v157_v14, %v155_v15 }
  0xa3   :  { %v160_v17 = vmax.f32 %v159_v16, 0.0 }
  0xa5   :  { %212 = vmatmul.msk.f32.vlgmr.msra.gmra.mxu0 %vm169_vm8, %v160_v17 }
 0x122   :  { %v190_v19 = vpop.f32.mrf.mxu0 }
 0x123   :  { %v191_v20 = vadd.f32 %v222_v18, %v190_v19 }
 0x125   :  { %193 = vst [vmem:[#allocation8] sm:$0xff] %v191_v20 }
 0x126   :  { %204 = dma.vmem_to_hbm [thread:$0]  %s200_s29, 128, %s202_s5, [#allocation5]  }
 0x127   :  { %299 = dma.done.wait [#allocation5], 128  }
 0x128   :  { %300 = vsyncadd [#allocation5], 4294967168 }
 0x129   :  { %209 = vsyncpa [#allocation4], 1 }
 0x12a   :  { %210 = vsyncpa [#allocation7], 1 }
 0x12b   :  { %211 = vsyncpa [#allocation5], 1 }

</bundles_post_ra>
